<compile_context>
chip_gen: v7x
topology: tpu7x:2x2x1
jax: 0.10.0
libtpu: 0.0.40
codegen_flags: <defaults>
</compile_context>

<pallas_src>
import functools

import jax
import jax.numpy as jnp
from jax.experimental import pallas as pl
from jax.experimental.pallas import tpu as pltpu

_MAX_BLOCK_ROWS = 4096


def _round_up(x, m):
    return ((x + m - 1) // m) * m


# --------------------------------------------------------------------------
# Kernel
# --------------------------------------------------------------------------
def _lp_kernel(include_edge, vpu_out, *refs):
    """One row-tile of the fused LinkPredictor forward."""
    if include_edge:
        (zs_ref, zd_ref, msg_ref, ws_ref, wd_ref, bh_ref,
         wfh_ref, wfe_ref, bf_ref, out_ref) = refs
    else:
        (zs_ref, zd_ref, ws_ref, wd_ref, bh_ref,
         wfh_ref, bf_ref, out_ref) = refs
        msg_ref = wfe_ref = None

    # Two accumulating K=C MXU matmuls (no VMEM staging copy), f32 accumulate.
    h = jnp.dot(zs_ref[...], ws_ref[...], preferred_element_type=jnp.float32)
    h = h + jnp.dot(zd_ref[...], wd_ref[...], preferred_element_type=jnp.float32)
    h = jnp.maximum(h + bh_ref[...], 0.0)               # f32 bias + relu

    if include_edge:
        # relu applies to the concatenated msg columns as well.
        m32 = jnp.maximum(msg_ref[...].astype(jnp.float32), 0.0)

    if vpu_out:
        # out_channels == 1: weighted row-sum via VPU multiply + XLU lane
        # reduction.  Avoids a degenerate-N MXU matmul and output padding.
        out = jnp.sum(h * wfh_ref[...].astype(jnp.float32),
                      axis=-1, keepdims=True)
        if include_edge:
            out = out + jnp.sum(m32 * wfe_ref[...].astype(jnp.float32),
                                axis=-1, keepdims=True)
    else:
        # relu(cat(h,msg)) @ Wf.T == relu(h) @ Wf[:, :H].T + relu(msg) @ Wf[:, H:].T
        out = jnp.dot(h.astype(wfh_ref.dtype), wfh_ref[...],
                      preferred_element_type=jnp.float32)
        if include_edge:
            out = out + jnp.dot(m32.astype(wfe_ref.dtype), wfe_ref[...],
                                preferred_element_type=jnp.float32)

    out_ref[...] = (out + bf_ref[...]).astype(out_ref.dtype)


# --------------------------------------------------------------------------
# One-time parameter preparation (transpose / merge / cast)
# --------------------------------------------------------------------------
def prepare_params(params, *, include_edge=False, dtype=jnp.bfloat16):
    """Convert PyTorch-layout params into kernel-ready operands (done once).

    Weights are transposed to [in, out], the two projection biases merged,
    and everything cast to the streaming dtype (bf16 by default: the kernel
    is HBM-bound on v5e/v6e/v7x).  Biases stay f32; the kernel accumulates,
    adds bias and applies relu in f32.
    """
    h_dim, c_dim = params["w_src"].shape
    assert params["w_dst"].shape == (h_dim, c_dim)
    o_dim, fin_in = params["w_final"].shape
    e_dim = fin_in - h_dim if include_edge else 0
    if include_edge:
        assert e_dim > 0, "include_edge=True requires edge_dim > 0"
    else:
        assert fin_in == h_dim

    prep = {
        "c": c_dim, "h": h_dim, "o": o_dim, "e": e_dim,
        "include_edge": include_edge,
        "w_src": params["w_src"].T.astype(dtype),                      # (C, H)
        "w_dst": params["w_dst"].T.astype(dtype),                      # (C, H)
        "b_hid": (params["b_src"] + params["b_dst"])
                 .reshape(1, h_dim).astype(jnp.float32),               # (1, H)
        "b_fin": params["b_final"].reshape(1, o_dim).astype(jnp.float32),
    }
    wf = params["w_final"]                                             # (O, H[+E])
    if o_dim == 1:
        # Lane-dense row vectors for the VPU/XLU output path.
        prep["w_fin_h"] = wf[:, :h_dim].astype(dtype)                  # (1, H)
        if include_edge:
            prep["w_fin_e"] = wf[:, h_dim:].astype(dtype)              # (1, E)
    else:
        prep["w_fin_h"] = wf[:, :h_dim].T.astype(dtype)                # (H, O)
        if include_edge:
            prep["w_fin_e"] = wf[:, h_dim:].T.astype(dtype)            # (E, O)
    return prep


# --------------------------------------------------------------------------
# Generation-aware tiling helpers
# --------------------------------------------------------------------------
def _num_tensorcores():
    """TensorCores sharing the 'parallel' grid axis (v7x/v5p/v4: 2; else 1)."""
    try:
        kind = jax.devices()[0].device_kind.lower()
    except Exception:
        return 1
    if any(tag in kind for tag in ("v7", "7x", "v5p", "v4")):
        return 2
    return 1


def _vmem_caps():
    """(row-stream VMEM budget, vmem_limit cap) for this generation."""
    cap = None
    try:
        cap = int(pltpu.get_tpu_info().vmem_capacity_bytes)
    except Exception:
        pass
    if cap is not None and cap >= 96 * 1024 * 1024:        # v5e/v6e: 128 MiB
        return 40 * 1024 * 1024, 96 * 1024 * 1024
    return 20 * 1024 * 1024, 48 * 1024 * 1024               # v7x: 64 MiB / TC


def _choose_block_rows(n, c, e, h_dim, o, in_itemsize, out_itemsize,
                       num_cores, stream_budget):
    pack = 8 if in_itemsize >= 4 else (16 if in_itemsize == 2 else 32)
    if n <= pack:
        return _round_up(max(n, 1), 8)
    # Per-row VMEM: double-buffered in/out streams + f32 intermediates.
    per_row = (2 * ((2 * c + e) * in_itemsize + o * out_itemsize)
               + 3 * h_dim * 4)
    bm = max(pack, min(_MAX_BLOCK_ROWS, stream_budget // max(per_row, 1)))
    if num_cores > 1:
        # Keep all TensorCores fed under dimension_semantics=("parallel",).
        bm = min(bm, _round_up(pl.cdiv(n, num_cores), pack))
    bm = min(bm, _round_up(n, pack))
    return max(pack, (bm // pack) * pack)


# --------------------------------------------------------------------------
# Forward wrapper
# --------------------------------------------------------------------------
def link_predictor(z_src, z_dst, prep, msg=None, *, block_rows=None,
                   out_dtype=jnp.float32):
    n, c = z_src.shape
    assert c == prep["c"], f"z_src feature dim {c} != prepared {prep['c']}"
    assert z_dst.shape == (n, c)
    include_edge = prep["include_edge"]
    h_dim, o_dim, e_dim = prep["h"], prep["o"], prep["e"]

    dtype = prep["w_src"].dtype
    z_src = z_src.astype(dtype)
    z_dst = z_dst.astype(dtype)
    if include_edge:
        assert msg is not None and msg.shape == (n, e_dim), (
            f"msg must have shape {(n, e_dim)}, got "
            f"{None if msg is None else msg.shape}")
        msg = msg.astype(dtype)

    isz = jnp.dtype(dtype).itemsize
    osz = jnp.dtype(out_dtype).itemsize
    stream_budget, vmem_cap = _vmem_caps()
    if block_rows is None:
        block_rows = _choose_block_rows(n, c, e_dim, h_dim, o_dim, isz, osz,
                                        _num_tensorcores(), stream_budget)
    grid = (pl.cdiv(n, block_rows),)

    def row(feat):
        return pl.BlockSpec((block_rows, feat), lambda i: (i, 0))

    def full(arr):
        return pl.BlockSpec(arr.shape, lambda i: (0, 0))

    args, in_specs = [z_src, z_dst], [row(c), row(c)]
    if include_edge:
        args.append(msg)
        in_specs.append(row(e_dim))
    for name in ("w_src", "w_dst", "b_hid", "w_fin_h"):
        args.append(prep[name])
        in_specs.append(full(prep[name]))
    if include_edge:
        args.append(prep["w_fin_e"])
        in_specs.append(full(prep["w_fin_e"]))
    args.append(prep["b_fin"])
    in_specs.append(full(prep["b_fin"]))

    weight_bytes = ((2 * c * h_dim + (h_dim + e_dim) * o_dim) * isz
                    + (h_dim + o_dim) * 4)

    # VMEM budget: double-buffered row streams + output + f32 temps + weights.
    est = (2 * block_rows * (2 * c + e_dim) * isz
           + 2 * block_rows * o_dim * osz
           + 2 * weight_bytes
           + 3 * block_rows * h_dim * 4)
    vmem_limit = int(min(max(2 * est, 16 * 1024 * 1024), vmem_cap))

    flops = 2 * n * (2 * c * h_dim + (h_dim + e_dim) * o_dim)
    bytes_accessed = n * ((2 * c + e_dim) * isz + o_dim * osz) + weight_bytes
    cost = pl.CostEstimate(flops=int(flops), transcendentals=0,
                           bytes_accessed=int(bytes_accessed))

    kernel = functools.partial(_lp_kernel, include_edge, o_dim == 1)

    return pl.pallas_call(
        kernel,
        out_shape=jax.ShapeDtypeStruct((n, o_dim), out_dtype),
        grid_spec=pltpu.PrefetchScalarGridSpec(
            num_scalar_prefetch=0,
            grid=grid,
            in_specs=in_specs,
            out_specs=pl.BlockSpec((block_rows, o_dim), lambda i: (i, 0)),
        ),
        compiler_params=pltpu.CompilerParams(
            dimension_semantics=("parallel",),
            vmem_limit_bytes=vmem_limit),
        cost_estimate=cost,
    )(*args)


# --------------------------------------------------------------------------
# Reference + init helpers (for the self-test)
# --------------------------------------------------------------------------
def _reference(z_src, z_dst, params, msg=None, include_edge=False):
    h = (z_src @ params["w_src"].T + params["b_src"]
         + z_dst @ params["w_dst"].T + params["b_dst"])
    if include_edge:
        h = jnp.concatenate((h, msg), axis=-1)
    h = jnp.maximum(h, 0.0)
    return h @ params["w_final"].T + params["b_final"]


def _init_params(key, in_channels, hidden_channels, out_channels,
                 include_edge=False, edge_dim=0):
    ks = jax.random.split(key, 6)
    fin_in = hidden_channels + edge_dim if include_edge else hidden_channels

    def lin(kw, kb, out_f, in_f):
        bound = 1.0 / jnp.sqrt(in_f)
        w = jax.random.uniform(kw, (out_f, in_f), jnp.float32, -bound, bound)
        b = jax.random.uniform(kb, (out_f,), jnp.float32, -bound, bound)
        return w, b

    w_src, b_src = lin(ks[0], ks[1], hidden_channels, in_channels)
    w_dst, b_dst = lin(ks[2], ks[3], hidden_channels, in_channels)
    w_fin, b_fin = lin(ks[4], ks[5], out_channels, fin_in)
    return {"w_src": w_src, "b_src": b_src,
            "w_dst": w_dst, "b_dst": b_dst,
            "w_final": w_fin, "b_final": b_fin}


if __name__ == "__main__":
    key = jax.random.PRNGKey(0)
    k_zs, k_zd, k_msg, k_p1, k_p2, k_p3, k_big = jax.random.split(key, 7)

    N, C, H, O, E = 8, 32, 32, 1, 16

    z_src = jax.random.normal(k_zs, (N, C), jnp.float32)
    z_dst = jax.random.normal(k_zd, (N, C), jnp.float32)
    msg = jax.random.normal(k_msg, (N, E), jnp.float32)

    # ---- include_edge=False, O=1 (VPU output path), f32 weights ----
    params = _init_params(k_p1, C, H, O, include_edge=False)
    prep = prepare_params(params, include_edge=False, dtype=jnp.float32)
    out = link_predictor(z_src, z_dst, prep)
    jax.block_until_ready(out)
    ref = _reference(z_src, z_dst, params, include_edge=False)
    assert out.shape == (N, O)
    assert jnp.allclose(out, ref, atol=1e-3, rtol=1e-3)

    # ---- include_edge=True (edge_dim=E), O=1, f32 weights ----
    params_e = _init_params(k_p2, C, H, O, include_edge=True, edge_dim=E)
    prep_e = prepare_params(params_e, include_edge=True, dtype=jnp.float32)
    out_e = link_predictor(z_src, z_dst, prep_e, msg=msg)
    jax.block_until_ready(out_e)
    ref_e = _reference(z_src, z_dst, params_e, msg=msg, include_edge=True)
    assert out_e.shape == (N, O)
    assert jnp.allclose(out_e, ref_e, atol=1e-3, rtol=1e-3)

    # ---- include_edge=True, default bf16 streaming (f32 accumulate) ----
    prep_bf = prepare_params(params_e, include_edge=True)        # bf16 default
    out_bf = link_predictor(z_src, z_dst, prep_bf, msg=msg)
    jax.block_until_ready(out_bf)
    assert out_bf.shape == (N, O)
    assert out_bf.dtype == jnp.float32
    assert jnp.allclose(out_bf, ref_e, atol=0.15, rtol=0.05)

    # ---- O>1 (MXU output path), multi-step ragged grid, f32 weights ----
    N2, O2 = 300, 8
    zs2 = jax.random.normal(jax.random.fold_in(k_big, 0), (N2, C), jnp.float32)
    zd2 = jax.random.normal(jax.random.fold_in(k_big, 1), (N2, C), jnp.float32)
    msg2 = jax.random.normal(jax.random.fold_in(k_big, 2), (N2, E), jnp.float32)
    params_m = _init_params(k_p3, C, H, O2, include_edge=True, edge_dim=E)
    prep_m = prepare_params(params_m, include_edge=True, dtype=jnp.float32)
    out_m = link_predictor(zs2, zd2, prep_m, msg=msg2, block_rows=128)
    jax.block_until_ready(out_m)
    ref_m = _reference(zs2, zd2, params_m, msg=msg2, include_edge=True)
    assert out_m.shape == (N2, O2)
    assert jnp.allclose(out_m, ref_m, atol=1e-3, rtol=1e-3)

    print("KERNEL_OK")
</pallas_src>

<mosaic_0001>
module attributes {stable_mosaic.version = 11 : i64} {
  func.func @_lp_kernel(%arg0: i32, %arg1: memref<8x32xf32, #tpu.memory_space<vmem>>, %arg2: memref<8x32xf32, #tpu.memory_space<vmem>>, %arg3: memref<32x32xf32, #tpu.memory_space<vmem>>, %arg4: memref<32x32xf32, #tpu.memory_space<vmem>>, %arg5: memref<1x32xf32, #tpu.memory_space<vmem>>, %arg6: memref<1x32xf32, #tpu.memory_space<vmem>>, %arg7: memref<1x1xf32, #tpu.memory_space<vmem>>, %arg8: memref<8x1xf32, #tpu.memory_space<vmem>>) attributes {dimension_semantics = [#tpu.dimension_semantics<parallel>], iteration_bounds = array<i64: 1>, scalar_prefetch = 0 : i64, scratch_operands = 0 : i64, tpu.core_type = #tpu.core_type<tc>, window_params = [{transform_indices = @transform_0, window_bounds = array<i64: 8, 32>}, {transform_indices = @transform_1, window_bounds = array<i64: 8, 32>}, {pipeline_mode = #tpu.pipeline_mode<synchronous>, transform_indices = @transform_2, window_bounds = array<i64: 32, 32>}, {pipeline_mode = #tpu.pipeline_mode<synchronous>, transform_indices = @transform_3, window_bounds = array<i64: 32, 32>}, {pipeline_mode = #tpu.pipeline_mode<synchronous>, transform_indices = @transform_4, window_bounds = array<i64: 1, 32>}, {pipeline_mode = #tpu.pipeline_mode<synchronous>, transform_indices = @transform_5, window_bounds = array<i64: 1, 32>}, {pipeline_mode = #tpu.pipeline_mode<synchronous>, transform_indices = @transform_6, window_bounds = array<i64: 1, 1>}, {transform_indices = @transform_7, window_bounds = array<i64: 8, 1>}]} {
    %c0 = arith.constant 0 : index
    %c0_0 = arith.constant 0 : index
    %0 = vector.load %arg1[%c0, %c0_0] : memref<8x32xf32, #tpu.memory_space<vmem>>, vector<8x32xf32>
    %c0_1 = arith.constant 0 : index
    %c0_2 = arith.constant 0 : index
    %1 = vector.load %arg3[%c0_1, %c0_2] : memref<32x32xf32, #tpu.memory_space<vmem>>, vector<32x32xf32>
    %cst = arith.constant dense<0.000000e+00> : vector<8x32xf32>
    %2 = tpu.matmul %0, %1, %cst {dimension_numbers = #tpu.dot_dimension_numbers<[1], [0], [0], [1], [0, 0, 1, 1], [], []>} : vector<8x32xf32>, vector<32x32xf32>, vector<8x32xf32> -> vector<8x32xf32>
    %c0_3 = arith.constant 0 : index
    %c0_4 = arith.constant 0 : index
    %3 = vector.load %arg2[%c0_3, %c0_4] : memref<8x32xf32, #tpu.memory_space<vmem>>, vector<8x32xf32>
    %c0_5 = arith.constant 0 : index
    %c0_6 = arith.constant 0 : index
    %4 = vector.load %arg4[%c0_5, %c0_6] : memref<32x32xf32, #tpu.memory_space<vmem>>, vector<32x32xf32>
    %cst_7 = arith.constant dense<0.000000e+00> : vector<8x32xf32>
    %5 = tpu.matmul %3, %4, %cst_7 {dimension_numbers = #tpu.dot_dimension_numbers<[1], [0], [0], [1], [0, 0, 1, 1], [], []>} : vector<8x32xf32>, vector<32x32xf32>, vector<8x32xf32> -> vector<8x32xf32>
    %6 = arith.addf %2, %5 : vector<8x32xf32>
    %c0_8 = arith.constant 0 : index
    %c0_9 = arith.constant 0 : index
    %7 = vector.load %arg5[%c0_8, %c0_9] : memref<1x32xf32, #tpu.memory_space<vmem>>, vector<1x32xf32>
    %8 = vector.broadcast %7 : vector<1x32xf32> to vector<8x32xf32>
    %9 = arith.addf %6, %8 : vector<8x32xf32>
    %cst_10 = arith.constant 0.000000e+00 : f32
    %10 = vector.broadcast %cst_10 : f32 to vector<8x32xf32>
    %11 = arith.maximumf %9, %10 : vector<8x32xf32>
    %c0_11 = arith.constant 0 : index
    %c0_12 = arith.constant 0 : index
    %12 = vector.load %arg6[%c0_11, %c0_12] : memref<1x32xf32, #tpu.memory_space<vmem>>, vector<1x32xf32>
    %13 = vector.broadcast %12 : vector<1x32xf32> to vector<8x32xf32>
    %14 = arith.mulf %11, %13 : vector<8x32xf32>
    %cst_13 = arith.constant dense<0.000000e+00> : vector<8xf32>
    %15 = vector.multi_reduction <add>, %14, %cst_13 [1] : vector<8x32xf32> to vector<8xf32>
    %16 = vector.shape_cast %15 : vector<8xf32> to vector<8x1xf32>
    %c0_14 = arith.constant 0 : index
    %c0_15 = arith.constant 0 : index
    %17 = vector.load %arg7[%c0_14, %c0_15] : memref<1x1xf32, #tpu.memory_space<vmem>>, vector<1x1xf32>
    %18 = vector.broadcast %17 : vector<1x1xf32> to vector<8x1xf32>
    %19 = arith.addf %16, %18 : vector<8x1xf32>
    %c0_16 = arith.constant 0 : index
    %c0_17 = arith.constant 0 : index
    %20 = vector.load %arg8[%c0_16, %c0_17] : memref<8x1xf32, #tpu.memory_space<vmem>>, vector<8x1xf32>
    tpu.vector_store %arg8[%c0_16, %c0_17], %19 {strides = array<i32>} : memref<8x1xf32, #tpu.memory_space<vmem>>, vector<8x1xf32>,
    return
  }
  func.func @transform_0(%arg0: i32) -> (i32, i32) {
    %c0_i32 = arith.constant 0 : i32
    %c0_i32_0 = arith.constant 0 : i32
    return %arg0, %c0_i32 : i32, i32
  }
  func.func @transform_1(%arg0: i32) -> (i32, i32) {
    %c0_i32 = arith.constant 0 : i32
    %c0_i32_0 = arith.constant 0 : i32
    return %arg0, %c0_i32 : i32, i32
  }
  func.func @transform_2(%arg0: i32) -> (i32, i32) {
    %c0_i32 = arith.constant 0 : i32
    %c0_i32_0 = arith.constant 0 : i32
    %c0_i32_1 = arith.constant 0 : i32
    return %c0_i32, %c0_i32_0 : i32, i32
  }
  func.func @transform_3(%arg0: i32) -> (i32, i32) {
    %c0_i32 = arith.constant 0 : i32
    %c0_i32_0 = arith.constant 0 : i32
    %c0_i32_1 = arith.constant 0 : i32
    return %c0_i32, %c0_i32_0 : i32, i32
  }
  func.func @transform_4(%arg0: i32) -> (i32, i32) {
    %c0_i32 = arith.constant 0 : i32
    %c0_i32_0 = arith.constant 0 : i32
    %c0_i32_1 = arith.constant 0 : i32
    return %c0_i32, %c0_i32_0 : i32, i32
  }
  func.func @transform_5(%arg0: i32) -> (i32, i32) {
    %c0_i32 = arith.constant 0 : i32
    %c0_i32_0 = arith.constant 0 : i32
    %c0_i32_1 = arith.constant 0 : i32
    return %c0_i32, %c0_i32_0 : i32, i32
  }
  func.func @transform_6(%arg0: i32) -> (i32, i32) {
    %c0_i32 = arith.constant 0 : i32
    %c0_i32_0 = arith.constant 0 : i32
    %c0_i32_1 = arith.constant 0 : i32
    return %c0_i32, %c0_i32_0 : i32, i32
  }
  func.func @transform_7(%arg0: i32) -> (i32, i32) {
    %c0_i32 = arith.constant 0 : i32
    %c0_i32_0 = arith.constant 0 : i32
    return %arg0, %c0_i32 : i32, i32
  }
}

</mosaic_0001>

<bundles_post_ra>
// kernel: tpu_custom_call.1
= control target key start
LH: loop header
LB: loop body
LE: loop exit
PB: predicated region body
PF: predicated region fallthrough
CT: control target
= control target key end

     0   :  { %s534_s0 = inlined_call_operand.hbm [shape: f32[8,32], index: 0, kind: input, shape index: {}]   ;;  %s535_s1 = inlined_call_operand.hbm [shape: f32[8,32], index: 1, kind: input, shape index: {}]   ;;  %s536_s2 = inlined_call_operand.hbm [shape: f32[32,32], index: 2, kind: input, shape index: {}]   ;;  %s537_s3 = inlined_call_operand.hbm [shape: f32[32,32], index: 3, kind: input, shape index: {}]   ;;  %s538_s4 = inlined_call_operand.vmem [shape: f32[1,32], index: 4, kind: input, shape index: {}]   ;;  %s539_s5 = inlined_call_operand.vmem [shape: f32[1,32], index: 5, kind: input, shape index: {}]   ;;  %s540_s6 = inlined_call_operand.<no memory space> [shape: f32[1,1], index: 6, kind: input, shape index: {}]   ;;  %s541_s7 = inlined_call_operand.vmem [shape: f32[8,1], index: 7, kind: output, shape index: {}]  }
   0x1   :  { %v12_v0 = vstv %s540_s6 }
   0x2   :  { %13 = vst [vmem:[#allocation2] sm:$0x1] %v12_v0 }
   0x3   :  { %14 = vsyncpa [#allocation4], 0 }
   0x4   :  { %15 = vsyncpa [#allocation6], 0 }
   0x5   :  { %16 = vsyncpa [#allocation9], 0  ;;  %s425_s26 = smov [#allocation5]   ;;  %s426_s28 = smov [#allocation3]  }
   0x6   :  { %s33_s27 = sshll.u32 %s425_s26, 4  ;;  %s23_s29 = sshll.u32 %s426_s28, 4  ;;  %s34_s27 = int_to_ptr.vmem [resolvable:$true] %s33_s27  ;;  %s24_s29 = int_to_ptr.vmem [resolvable:$true] %s23_s29 }
   0x7   :  { %s331_s9 = scalar_lea.hbm %s535_s1, 128 }
   0x8   :  { %p332_p0 = scmp.ne.s32.totalorder %s535_s1, %s331_s9  ;;  %p335_p1 = scmp.lt.u32.totalorder %s331_s9, %s535_s1 }
   0xa   :  { %p337_p2 = pnand %p335_p1, %p332_p0 }
   0xc   :  { %340 = shalt.err (!%p337_p2)
}
   0xd   :  { %s341_s13 = scalar_lea.vmem %s34_s27, 128  ;;  %p346_p4 = scmp.lt.s32.totalorder %s34_s27, %s34_s27 }
   0xe   :  { %p342_p3 = scmp.ne.s32.totalorder %s34_s27, %s341_s13  ;;  %p347_p5 = scmp.lt.s32.totalorder %s341_s13, %s341_s13 }
  0x10   :  { %p348_p6 = por %p347_p5, %p346_p4 }
  0x12   :  { %p349_p7 = pnand %p348_p6, %p342_p3 }
  0x14   :  { %352 = shalt.err (!%p349_p7)
}
  0x15   :  { %36 = dma.hbm_to_vmem [thread:$0]  %s535_s1, 128, %s34_s27, [#allocation6]  }
  0x16   :  { %s353_s18 = scalar_lea.hbm %s534_s0, 128 }
  0x17   :  { %p354_p8 = scmp.ne.s32.totalorder %s534_s0, %s353_s18  ;;  %p357_p9 = scmp.lt.u32.totalorder %s353_s18, %s534_s0 }
  0x19   :  { %p359_p10 = pnand %p357_p9, %p354_p8 }
  0x1b   :  { %362 = shalt.err (!%p359_p10)
}
  0x1c   :  { %s363_s23 = scalar_lea.vmem %s24_s29, 128  ;;  %p368_p12 = scmp.lt.s32.totalorder %s24_s29, %s24_s29 }
  0x1d   :  { %p364_p11 = scmp.ne.s32.totalorder %s24_s29, %s363_s23  ;;  %p369_p13 = scmp.lt.s32.totalorder %s363_s23, %s363_s23 }
  0x1f   :  { %p370_p0 = por %p369_p13, %p368_p12 }
  0x21   :  { %p371_p1 = pnand %p370_p0, %p364_p11 }
  0x23   :  { %374 = shalt.err (!%p371_p1)
}
  0x24   :  { %26 = dma.hbm_to_vmem [thread:$0]  %s534_s0, 128, %s24_s29, [#allocation4]  }
  0x25   :  { %s427_s25 = smov [#allocation7]   ;;  %s375_s30 = scalar_lea.hbm %s536_s2, 512 }
  0x26   :  { %s42_s26 = sshll.u32 %s427_s25, 4  ;;  %p376_p2 = scmp.ne.s32.totalorder %s536_s2, %s375_s30  ;;  %s43_s26 = int_to_ptr.vmem [resolvable:$true] %s42_s26 }
  0x27   :  { %p379_p3 = scmp.lt.u32.totalorder %s375_s30, %s536_s2 }
  0x29   :  { %p381_p4 = pnand %p379_p3, %p376_p2 }
  0x2b   :  { %384 = shalt.err (!%p381_p4)
}
  0x2c   :  { %s385_s12 = scalar_lea.vmem %s43_s26, 512  ;;  %p390_p6 = scmp.lt.s32.totalorder %s43_s26, %s43_s26 }
  0x2d   :  { %p386_p5 = scmp.ne.s32.totalorder %s43_s26, %s385_s12  ;;  %p391_p7 = scmp.lt.s32.totalorder %s385_s12, %s385_s12 }
  0x2f   :  { %p392_p8 = por %p391_p7, %p390_p6 }
  0x31   :  { %p393_p9 = pnand %p392_p8, %p386_p5 }
  0x33   :  { %396 = shalt.err (!%p393_p9)
}
  0x34   :  { %s428_s0 = smov 128   ;;  %s429_s29 = smov 8  }
  0x35   :  { %48 = dma.hbm_to_vmem [thread:$0]  %s536_s2, 512, %s43_s26, [#allocation6], %s428_s0, %s428_s0, %s429_s29  }
  0x36   :  { %s430_s14 = smov [#allocation8]   ;;  %s397_s18 = scalar_lea.hbm %s537_s3, 512 }
  0x37   :  { %s54_s15 = sshll.u32 %s430_s14, 4  ;;  %p398_p10 = scmp.ne.s32.totalorder %s537_s3, %s397_s18  ;;  %s55_s15 = int_to_ptr.vmem [resolvable:$true] %s54_s15 }
  0x38   :  { %p401_p11 = scmp.lt.u32.totalorder %s397_s18, %s537_s3 }
  0x3a   :  { %p403_p12 = pnand %p401_p11, %p398_p10 }
  0x3c   :  { %406 = shalt.err (!%p403_p12)
}
  0x3d   :  { %s407_s23 = scalar_lea.vmem %s55_s15, 512  ;;  %p412_p0 = scmp.lt.s32.totalorder %s55_s15, %s55_s15 }
  0x3e   :  { %p408_p13 = scmp.ne.s32.totalorder %s55_s15, %s407_s23  ;;  %p413_p1 = scmp.lt.s32.totalorder %s407_s23, %s407_s23 }
  0x40   :  { %p414_p2 = por %p413_p1, %p412_p0 }
  0x42   :  { %p415_p3 = pnand %p414_p2, %p408_p13 }
  0x44   :  { %418 = shalt.err (!%p415_p3)
}
  0x45   :  { %60 = dma.hbm_to_vmem [thread:$0]  %s537_s3, 512, %s55_s15, [#allocation9], %s428_s0, %s428_s0, %s429_s29  }
  0x46   :  { %419 = dma.done.wait [#allocation4], 128  }
  0x47   :  { %420 = vsyncadd [#allocation4], 4294967168 }
  0x48   :  { %421 = dma.done.wait [#allocation6], 640  }
  0x49   :  { %422 = vsyncadd [#allocation6], 4294966656 }
  0x4a   :  { %423 = dma.done.wait [#allocation9], 512  }
  0x4b   :  { %424 = vsyncadd [#allocation9], 4294966784  ;;  %v431_v1 = vmov 0.0|0.0   ;;  %vm432_vm0 = vmmov 0   ;;  %v433_v2 = vmov 0.0   ;;  %v85_v3 = vld [vmem:[#allocation8] sm:$0xff] }
  0x4c   :  { %310 = vmatprep.subr.bf16.mxu0 %v431_v1  ;;  %316 = vmatprep.subr.bf16.mxu1 %v431_v1  ;;  %v86_v4 = vld [vmem:[#allocation8 + $0x8] sm:$0xff]  ;;  %v80_v5 = vld [vmem:[#allocation7] sm:$0xff]  ;;  %v87_v8 = vld [vmem:[#allocation8 + $0x10] sm:$0xff]  ;;  %vm89_vm1 = vcmask 261120   ;;  %vm264_vm2 = vcmask 7168  }
  0x4d   :  { %296 = vmatprep.mubr.msk.f32.mxu0 %vm432_vm0, %v433_v2  ;;  %307 = vmatprep.mubr.msk.f32.mxu1 %vm432_vm0, %v433_v2  ;;  %v311_v6 = vpack.c.bf16 %v86_v4, %v85_v3  ;;  %v81_v7 = vld [vmem:[#allocation7 + $0x8] sm:$0xff]  ;;  %v88_v9 = vld [vmem:[#allocation8 + $0x18] sm:$0xff]  ;;  %v82_v11 = vld [vmem:[#allocation7 + $0x10] sm:$0xff] }
  0x4e   :  { %v317_v10 = vpack.c.bf16 %v81_v7, %v80_v5  ;;  %v83_v12 = vld [vmem:[#allocation7 + $0x18] sm:$0xff]  ;;  %v314_v13 = vpack.c.bf16 %v88_v9, %v87_v8  ;;  %v79_v16 = vld [vmem:[#allocation3] sm:$0xff]  ;;  %v275_v19 = vld [vmem:[%s538_s4] ss:$0 sm:$0xff] }
  0x4f   :  { %312 = vmatpush3.bf16.msra.mxu0 %v311_v6  ;;  %v320_v14 = vpack.c.bf16 %v83_v12, %v82_v11  ;;  %v84_v15 = vld [vmem:[#allocation5] sm:$0xff]  ;;  %v276_v24 = vld [vmem:[%s539_s5] ss:$0 sm:$0xff] }
  0x50   :  { %318 = vmatpush3.bf16.msra.mxu1 %v317_v10  ;;  %313 = vmatprep.subr.bf16.mxu0 %v431_v1  ;;  %v277_v28 = vld [vmem:[#allocation2] ss:$0 sm:$0xff] }
  0x51   :  { %319 = vmatprep.subr.bf16.mxu1 %v431_v1 }
  0x53   :  { %315 = vmatpush3.bf16.msra.mxu0 %v314_v13 }
  0x54   :  { %321 = vmatpush3.bf16.msra.mxu1 %v320_v14 }
  0x56   :  { %297 = vmatmul.mubr.msk.f32.vlgmr.msra.gmra.mrb[0].mxu0 %vm89_vm1, %v84_v15 }
  0x57   :  { %308 = vmatmul.mubr.msk.f32.vlgmr.msra.gmra.mrb[0].mxu1 %vm89_vm1, %v79_v16 }
 0x129   :  { %v159_v17 = vpop.f32.mrb[0].mxu0 }
 0x12a   :  { %v232_v18 = vpop.f32.mrb[0].mxu1  ;;  %v298_v20 = vpop.f32.mrb[1].mxu0 }
 0x12b   :  { %v233_v21 = vadd.f32 %v232_v18, %v159_v17  ;;  %v309_v22 = vpop.f32.mrb[1].mxu1 }
 0x12d   :  { %v243_v23 = vadd.f32 %v275_v19, %v233_v21 }
 0x12f   :  { %v244_v25 = vmax.f32 %v243_v23, 0.0 }
 0x131   :  { %v252_v26 = vmul.f32 %v276_v24, %v244_v25 }
 0x133   :  { %v253_v27 = vsel %vm89_vm1, %v252_v26, 0.0 }
 0x134   :  { %254 = vadd.xlane.f32.xlu0 %v253_v27 }
 0x1c1   :  { %v255_v29 = vpop.xlane.xlu0 %254 }
 0x1c2   :  { %v263_v30 = vadd.f32 %v277_v28, %v255_v29 }
 0x1c4   :  { %265 = vst.msk [vmem:[%s541_s7] sm:$0xff] %vm264_vm2, %v263_v30 }
 0x1c5   :  { %270 = vsyncpa [#allocation4], 1 }
 0x1c6   :  { %271 = vsyncpa [#allocation6], 1 }
 0x1c7   :  { %272 = vsyncpa [#allocation9], 1 }

</bundles_post_ra>
